<compile_context>
chip_gen: v5e
topology: v5e:2x2
jax: 0.10.0
libtpu: 0.0.40
codegen_flags: <defaults>
</compile_context>

<pallas_src>
import jax
import jax.numpy as jnp
from jax.experimental import pallas as pl
from jax.experimental.pallas import tpu as pltpu


def downsample_kernel(x_ref, wc_ref, pw_ref, o_ref):
    # x_ref:  (BN, C, 2*TH2, W)     wc_ref: (Cout, C)     pw_ref: (W, W2)
    # o_ref:  (BN, Cout, TH2, W2)  or  (BN, Cout, TH2*W2)  (lane-dense flat)
    bn, c, th, w = x_ref.shape
    th2 = th // 2
    w2 = pw_ref.shape[1]
    dt = x_ref.dtype

    # 1) H-pool: pair adjacent source rows with two slab-level strided reads
    #    (once per block; no per-row sublane extraction).
    even = x_ref[:, :, pl.ds(0, th2, stride=2), :]            # (BN, C, TH2, W)
    odd = x_ref[:, :, pl.ds(1, th2, stride=2), :]             # (BN, C, TH2, W)
    rows = even + odd                                         # activation dtype

    # 2) W-pool: one batched lane-compaction matmul over the whole slab.
    #    Flattening the leading dims is layout-free (last two dims unchanged).
    rows2d = rows.reshape(bn * c * th2, w)
    pooled = jnp.dot(rows2d, pw_ref[...],
                     preferred_element_type=jnp.float32)      # (BN*C*TH2, W2)
    # Cast back so the conv matmul runs activation-dtype x activation-dtype.
    pooled = pooled.astype(dt).reshape(bn, c, th2, w2)

    # 3) 1x1 conv (bias=False): one channel-mixing matmul per image against a
    #    lane-dense (C, TH2*W2) rhs; one full-slab store per image.
    wc = wc_ref[...]
    for b in range(bn):                                       # BN is small (<= 8)
        rhs = pooled[b].reshape(c, th2 * w2)                  # (C, TH2*W2)
        y = jnp.dot(wc, rhs, preferred_element_type=jnp.float32)  # (Cout, TH2*W2)
        if len(o_ref.shape) == 4:                             # native NCHW output
            o_ref[b] = y.reshape(y.shape[0], th2, w2).astype(o_ref.dtype)
        else:                                                 # lane-dense flat output
            o_ref[b] = y.astype(o_ref.dtype)


def _round_up(x, m):
    return ((x + m - 1) // m) * m


def _divisors(n):
    return [d for d in range(1, n + 1) if n % d == 0]


def _vmem_limit_bytes():
    """Scoped-VMEM limit gated on the chip's physical VMEM (64 MiB on v7x,
    128 MiB on v5e/v6e); conservative fallback when the query is unavailable."""
    phys = 64 * 1024 * 1024
    try:
        phys = int(pltpu.get_tpu_info().vmem_capacity_bytes)
    except Exception:
        pass
    return int(min(phys * 3 // 4, 112 * 1024 * 1024))


def _num_tensorcores():
    try:
        dev = jax.devices()[0]
    except Exception:
        return 1
    for attr in ("num_cores", "core_count"):
        v = getattr(dev, attr, None)
        if isinstance(v, int) and v > 0:
            return v
    return 1


def _choose_tiles(N, C, Cout, H2, W2, itemsize, flat_out, budget_bytes, num_cores):
    """Pick (BN images, TH2 output rows) per grid step.

    The footprint check accounts explicitly for double-buffering of the input
    and output blocks plus in-kernel intermediates (~1x the input block).
    Preference: fits the budget > step count divisible by the TensorCore count
    (keeps both v7x cores busy) > largest block.
    """
    W = 2 * W2

    def fits(bn, th2):
        x_blk = bn * C * (2 * th2) * W * itemsize
        if flat_out:
            o_blk = bn * _round_up(Cout, 8) * _round_up(th2 * W2, 128) * itemsize
        else:
            o_blk = bn * Cout * _round_up(th2, 8) * _round_up(W2, 128) * itemsize
        return 2 * (x_blk + o_blk) + x_blk <= budget_bytes

    def valid(th2):
        if th2 == H2:
            return True                        # full-extent block: always legal
        if H2 % th2 or (2 * th2) % 8:
            return False                       # grid must divide; input sublane tiling
        if flat_out:
            return (th2 * W2) % 128 == 0       # flat output needs lane-multiple blocks
        return th2 % 8 == 0                    # 4D output sublane tiling

    th2_cands = sorted(d for d in range(1, H2 + 1) if valid(d))
    bn_cands = [d for d in _divisors(N) if d <= 8]      # keep the static loop tiny
    best = None
    for th2 in th2_cands:
        for bn in bn_cands:
            if not fits(bn, th2):
                continue
            steps = (N // bn) * (H2 // th2)
            core_ok = num_cores <= 1 or steps % num_cores == 0
            key = (core_ok, bn * th2, th2)
            if best is None or key > best[0]:
                best = (key, (bn, th2))
    if best is None:
        # Nothing fits the budget (very wide images): fall back to the smallest
        # legal tile and let the compiler try.
        # TODO(synk): add a W tile axis to the grid for very wide images.
        return 1, th2_cands[0]
    return best[1]


def downsample(x, wc, *, vmem_limit_bytes=None):
    """x: (N, C, H, W); wc: (Cout, C) = PyTorch Conv2d weight (Cout, C, 1, 1) squeezed."""
    N, C, H, W_in = x.shape
    wc = wc.reshape(wc.shape[0], -1)
    Cout = wc.shape[0]
    assert wc.shape[1] == C

    H2, W2 = H // 2, W_in // 2
    # Bilinear(0.5, align_corners=False) only reads the first 2*H2 x 2*W2 pixels
    # (no clamping is ever needed), so odd trailing rows/cols are simply dropped.
    x = x[:, :, : 2 * H2, : 2 * W2]
    W = 2 * W2
    dt = x.dtype
    itemsize = x.dtype.itemsize

    # Keep both MXU operands in the activation dtype (f32 accumulation in-kernel).
    wc = wc.astype(dt)
    # (W, W2) selector with 0.25 at rows (2j, 2j+1) of column j; together with the
    # in-kernel row-pair add this realises the exact 2x2 mean.
    pw = (0.25 * jnp.repeat(jnp.eye(W2, dtype=jnp.float32), 2, axis=0)).astype(dt)

    flat_out = (W2 % 128) != 0            # lane-dense output slab for narrow images
    vmem_limit = int(vmem_limit_bytes or _vmem_limit_bytes())
    weights_bytes = wc.size * itemsize + pw.size * itemsize
    budget = max((7 * vmem_limit) // 10 - weights_bytes, 1 << 20)
    BN, TH2 = _choose_tiles(N, C, Cout, H2, W2, itemsize, flat_out, budget,
                            _num_tensorcores())
    TH = 2 * TH2
    grid = (N // BN, H2 // TH2)

    if flat_out:
        out_shape = jax.ShapeDtypeStruct((N, Cout, H2 * W2), dt)
        out_spec = pl.BlockSpec((BN, Cout, TH2 * W2), lambda n, t: (n, 0, t))
    else:
        out_shape = jax.ShapeDtypeStruct((N, Cout, H2, W2), dt)
        out_spec = pl.BlockSpec((BN, Cout, TH2, W2), lambda n, t: (n, 0, t, 0))

    flops = int(2 * N * C * H2 * W2 * W             # pooling matmul
                + 2 * N * Cout * C * H2 * W2        # 1x1 conv matmul
                + N * C * H2 * W)                   # row-pair add
    bytes_accessed = int((x.size + N * Cout * H2 * W2) * itemsize
                         + wc.size * itemsize + pw.size * itemsize)

    out = pl.pallas_call(
        downsample_kernel,
        out_shape=out_shape,
        grid_spec=pltpu.PrefetchScalarGridSpec(
            num_scalar_prefetch=0,
            grid=grid,
            in_specs=[
                pl.BlockSpec((BN, C, TH, W), lambda n, t: (n, 0, t, 0)),
                pl.BlockSpec((Cout, C), lambda n, t: (0, 0)),    # resident conv weight
                pl.BlockSpec((W, W2), lambda n, t: (0, 0)),      # resident pooling selector
            ],
            out_specs=out_spec,
        ),
        compiler_params=pltpu.CompilerParams(
            dimension_semantics=("parallel", "parallel"),
            vmem_limit_bytes=vmem_limit,
        ),
        cost_estimate=pl.CostEstimate(
            flops=flops, transcendentals=0, bytes_accessed=bytes_accessed),
    )(x, wc, pw)

    if flat_out:
        out = out.reshape(N, Cout, H2, W2)
    return out


def downsample_ref(x, wc):
    """Pure-JAX reference mirroring the PyTorch module (bilinear 0.5 == 2x2 avg pool)."""
    N, C, H, W = x.shape
    H2, W2 = H // 2, W // 2
    pooled = x[:, :, : 2 * H2, : 2 * W2].reshape(N, C, H2, 2, W2, 2).mean(axis=(3, 5))
    return jnp.einsum("oc,nchw->nohw", wc.reshape(wc.shape[0], -1), pooled)


if __name__ == "__main__":
    def run_case(key, N, C, H, W, s_factor):
        Cout = C + s_factor
        kx, kw = jax.random.split(key)
        # Quantize test data to a coarse binary grid so every intermediate (row
        # sums, 2x2 means, 1x1-conv products) is exactly representable even if
        # f32 matmuls are evaluated with bf16 passes on the MXU.
        x = jnp.round(jax.random.normal(kx, (N, C, H, W), dtype=jnp.float32) * 8.0) / 8.0
        wc = jnp.round(jax.random.normal(kw, (Cout, C), dtype=jnp.float32) * 4.0) / 16.0
        out = jax.block_until_ready(downsample(x, wc))
        ref = jax.block_until_ready(downsample_ref(x, wc))
        assert out.shape == (N, Cout, H // 2, W // 2), out.shape
        err = float(jnp.max(jnp.abs(out - ref)))
        assert jnp.allclose(out, ref, atol=1e-5, rtol=1e-5), err

    k0, k1 = jax.random.split(jax.random.PRNGKey(0))
    run_case(k0, 2, 4, 16, 16, 4)      # narrow image: lane-dense flat-output path (W2 < 128)
    run_case(k1, 2, 8, 16, 256, 4)     # wide image: native NCHW output path (W2 % 128 == 0)
    print("KERNEL_OK")
</pallas_src>

<mosaic_0001>
module attributes {stable_mosaic.version = 11 : i64} {
  func.func @downsample_kernel(%arg0: i32, %arg1: i32, %arg2: memref<2x4x16x16xf32, #tpu.memory_space<vmem>>, %arg3: memref<8x4xf32, #tpu.memory_space<vmem>>, %arg4: memref<16x8xf32, #tpu.memory_space<vmem>>, %arg5: memref<2x8x64xf32, #tpu.memory_space<vmem>>) attributes {dimension_semantics = [#tpu.dimension_semantics<parallel>, #tpu.dimension_semantics<parallel>], iteration_bounds = array<i64: 1, 1>, scalar_prefetch = 0 : i64, scratch_operands = 0 : i64, tpu.core_type = #tpu.core_type<tc>, window_params = [{transform_indices = @transform_0, window_bounds = array<i64: 2, 4, 16, 16>}, {pipeline_mode = #tpu.pipeline_mode<synchronous>, transform_indices = @transform_1, window_bounds = array<i64: 8, 4>}, {pipeline_mode = #tpu.pipeline_mode<synchronous>, transform_indices = @transform_2, window_bounds = array<i64: 16, 8>}, {transform_indices = @transform_3, window_bounds = array<i64: 2, 8, 64>}]} {
    %c0 = arith.constant 0 : index
    %c0_0 = arith.constant 0 : index
    %c0_1 = arith.constant 0 : index
    %c0_2 = arith.constant 0 : index
    %0 = tpu.strided_load %arg2[%c0, %c0_0, %c0_1, %c0_2] {strides = array<i32: 1, 1, 2, 1>} : memref<2x4x16x16xf32, #tpu.memory_space<vmem>>, vector<2x4x8x16xf32>
    %c0_3 = arith.constant 0 : index
    %c0_4 = arith.constant 0 : index
    %c1 = arith.constant 1 : index
    %c0_5 = arith.constant 0 : index
    %1 = tpu.strided_load %arg2[%c0_3, %c0_4, %c1, %c0_5] {strides = array<i32: 1, 1, 2, 1>} : memref<2x4x16x16xf32, #tpu.memory_space<vmem>>, vector<2x4x8x16xf32>
    %2 = arith.addf %0, %1 : vector<2x4x8x16xf32>
    %3 = vector.shape_cast %2 : vector<2x4x8x16xf32> to vector<64x16xf32>
    %c0_6 = arith.constant 0 : index
    %c0_7 = arith.constant 0 : index
    %4 = vector.load %arg4[%c0_6, %c0_7] : memref<16x8xf32, #tpu.memory_space<vmem>>, vector<16x8xf32>
    %cst = arith.constant dense<0.000000e+00> : vector<64x8xf32>
    %5 = tpu.matmul %3, %4, %cst {dimension_numbers = #tpu.dot_dimension_numbers<[1], [0], [0], [1], [0, 0, 1, 1], [], []>} : vector<64x16xf32>, vector<16x8xf32>, vector<64x8xf32> -> vector<64x8xf32>
    %6 = vector.shape_cast %5 : vector<64x8xf32> to vector<2x4x8x8xf32>
    %c0_8 = arith.constant 0 : index
    %c0_9 = arith.constant 0 : index
    %7 = vector.load %arg3[%c0_8, %c0_9] : memref<8x4xf32, #tpu.memory_space<vmem>>, vector<8x4xf32>
    %8 = vector.extract_strided_slice %6 {offsets = [0, 0, 0, 0], sizes = [1, 4, 8, 8], strides = [1, 1, 1, 1]} : vector<2x4x8x8xf32> to vector<1x4x8x8xf32>
    %9 = vector.shape_cast %8 : vector<1x4x8x8xf32> to vector<4x8x8xf32>
    %10 = vector.shape_cast %9 : vector<4x8x8xf32> to vector<4x64xf32>
    %cst_10 = arith.constant dense<0.000000e+00> : vector<8x64xf32>
    %11 = tpu.matmul %7, %10, %cst_10 {dimension_numbers = #tpu.dot_dimension_numbers<[1], [0], [0], [1], [0, 0, 1, 1], [], []>} : vector<8x4xf32>, vector<4x64xf32>, vector<8x64xf32> -> vector<8x64xf32>
    %c0_11 = arith.constant 0 : index
    %c0_12 = arith.constant 0 : index
    %c0_13 = arith.constant 0 : index
    %12 = vector.load %arg5[%c0_11, %c0_12, %c0_13] : memref<2x8x64xf32, #tpu.memory_space<vmem>>, vector<1x8x64xf32>
    %13 = vector.shape_cast %12 : vector<1x8x64xf32> to vector<8x64xf32>
    %14 = vector.shape_cast %11 : vector<8x64xf32> to vector<1x8x64xf32>
    tpu.vector_store %arg5[%c0_11, %c0_12, %c0_13], %14 {strides = array<i32>} : memref<2x8x64xf32, #tpu.memory_space<vmem>>, vector<1x8x64xf32>,
    %15 = vector.extract_strided_slice %6 {offsets = [1, 0, 0, 0], sizes = [1, 4, 8, 8], strides = [1, 1, 1, 1]} : vector<2x4x8x8xf32> to vector<1x4x8x8xf32>
    %16 = vector.shape_cast %15 : vector<1x4x8x8xf32> to vector<4x8x8xf32>
    %17 = vector.shape_cast %16 : vector<4x8x8xf32> to vector<4x64xf32>
    %cst_14 = arith.constant dense<0.000000e+00> : vector<8x64xf32>
    %18 = tpu.matmul %7, %17, %cst_14 {dimension_numbers = #tpu.dot_dimension_numbers<[1], [0], [0], [1], [0, 0, 1, 1], [], []>} : vector<8x4xf32>, vector<4x64xf32>, vector<8x64xf32> -> vector<8x64xf32>
    %c1_15 = arith.constant 1 : index
    %c0_16 = arith.constant 0 : index
    %c0_17 = arith.constant 0 : index
    %19 = vector.load %arg5[%c1_15, %c0_16, %c0_17] : memref<2x8x64xf32, #tpu.memory_space<vmem>>, vector<1x8x64xf32>
    %20 = vector.shape_cast %19 : vector<1x8x64xf32> to vector<8x64xf32>
    %21 = vector.shape_cast %18 : vector<8x64xf32> to vector<1x8x64xf32>
    tpu.vector_store %arg5[%c1_15, %c0_16, %c0_17], %21 {strides = array<i32>} : memref<2x8x64xf32, #tpu.memory_space<vmem>>, vector<1x8x64xf32>,
    return
  }
  func.func @transform_0(%arg0: i32, %arg1: i32) -> (i32, i32, i32, i32) {
    %c0_i32 = arith.constant 0 : i32
    %c0_i32_0 = arith.constant 0 : i32
    %c0_i32_1 = arith.constant 0 : i32
    return %arg0, %c0_i32, %arg1, %c0_i32_0 : i32, i32, i32, i32
  }
  func.func @transform_1(%arg0: i32, %arg1: i32) -> (i32, i32) {
    %c0_i32 = arith.constant 0 : i32
    %c0_i32_0 = arith.constant 0 : i32
    %c0_i32_1 = arith.constant 0 : i32
    return %c0_i32, %c0_i32_0 : i32, i32
  }
  func.func @transform_2(%arg0: i32, %arg1: i32) -> (i32, i32) {
    %c0_i32 = arith.constant 0 : i32
    %c0_i32_0 = arith.constant 0 : i32
    %c0_i32_1 = arith.constant 0 : i32
    return %c0_i32, %c0_i32_0 : i32, i32
  }
  func.func @transform_3(%arg0: i32, %arg1: i32) -> (i32, i32, i32) {
    %c0_i32 = arith.constant 0 : i32
    %c0_i32_0 = arith.constant 0 : i32
    return %arg0, %c0_i32, %arg1 : i32, i32, i32
  }
}

</mosaic_0001>

<bundles_post_ra>
// kernel: tpu_custom_call.1
= control target key start
LH: loop header
LB: loop body
LE: loop exit
PB: predicated region body
PF: predicated region fallthrough
CT: control target
= control target key end

     0   :  { %8 = vsyncpa [#allocation3], 0  ;;  %s605_s0 = inlined_call_operand.hbm [shape: f32[2,4,16,16], index: 0, kind: input, shape index: {}]   ;;  %s606_s1 = inlined_call_operand.vmem [shape: f32[8,4], index: 1, kind: input, shape index: {}]   ;;  %s607_s2 = inlined_call_operand.vmem [shape: f32[16,8], index: 2, kind: input, shape index: {}]   ;;  %s608_s3 = inlined_call_operand.hbm [shape: f32[2,8,64], index: 3, kind: output, shape index: {}]  }
   0x1   :  { %9 = vsyncpa [#allocation4], 0  ;;  %s14_s14 = sshll.u32 %s605_s0, 4  ;;  %s482_s15 = smov [#allocation2]   ;;  %s15_s14 = int_to_ptr.hbm [resolvable:$true] %s14_s14 }
   0x2   :  { %s16_s16 = sshll.u32 %s482_s15, 4  ;;  %s483_s17 = smov 128   ;;  %s17_s16 = int_to_ptr.vmem [resolvable:$true] %s16_s16 }
   0x3   :  { %s484_s18 = smov 8  }
   0x4   :  { %22 = dma.hbm_to_vmem [thread:$0]  %s15_s14, 2048, %s17_s16, [#allocation3], %s483_s17, %s483_s17, %s484_s18  }
   0x5   :  { %478 = dma.done.wait [#allocation3], 2048  }
   0x6   :  { %479 = vsyncadd [#allocation3], 4294965248  ;;  %v71_v0 = vld [vmem:[%s607_s2 + $0x8] sm:$0xff]  ;;  %v70_v1 = vld [vmem:[%s607_s2] sm:$0xff]  ;;  %vm72_vm0 = vcmask 130048   ;;  %vm140_vm1 = vcmask 1047556  }
   0x7   :  { %v31_v2 = vld [vmem:[#allocation2] ss:$2 sm:$0xff]  ;;  %111 = vmatpush.msra.mxu0 %v71_v0  ;;  %415 = vmatpush.msra.mxu3 %v71_v0  ;;  %v47_v3 = vld [vmem:[#allocation2 + $0x1] ss:$2 sm:$0xff]  ;;  %v41_v4 = vld [vmem:[#allocation2 + $0x50] ss:$2 sm:$0xff] }
   0x8   :  { %v57_v5 = vld [vmem:[#allocation2 + $0x51] ss:$2 sm:$0xff]  ;;  %v62_v6 = vadd.f32 %v47_v3, %v31_v2  ;;  %414 = vmatpush.msra.mxu1 %v71_v0  ;;  %v37_v8 = vld [vmem:[#allocation2 + $0x30] ss:$2 sm:$0xff]  ;;  %v43_v13 = vld [vmem:[#allocation2 + $0x60] ss:$2 sm:$0xff] }
   0x9   :  { %v67_v7 = vadd.f32 %v57_v5, %v41_v4  ;;  %v53_v9 = vld [vmem:[#allocation2 + $0x31] ss:$2 sm:$0xff]  ;;  %112 = vmatpush.msra.mxu0 %v70_v1  ;;  %417 = vmatpush.msra.mxu3 %v70_v1  ;;  %v33_v11 = vld [vmem:[#allocation2 + $0x10] ss:$2 sm:$0xff]  ;;  %v59_v14 = vld [vmem:[#allocation2 + $0x61] ss:$2 sm:$0xff] }
   0xa   :  { %v65_v10 = vadd.f32 %v53_v9, %v37_v8  ;;  %402 = vmatmul.msk.f32.vlgmr.msra.gmra.mxu0 %vm72_vm0, %v62_v6  ;;  %416 = vmatpush.msra.mxu1 %v70_v1  ;;  %v49_v12 = vld [vmem:[#allocation2 + $0x11] ss:$2 sm:$0xff]  ;;  %v39_v15 = vld [vmem:[#allocation2 + $0x40] ss:$2 sm:$0xff]  ;;  %v55_v16 = vld [vmem:[#allocation2 + $0x41] ss:$2 sm:$0xff]  ;;  %v68_v18 = vadd.f32 %v59_v14, %v43_v13 }
   0xb   :  { %407 = vmatmul.msk.f32.vlgmr.msra.gmra.mxu3 %vm72_vm0, %v67_v7  ;;  %v63_v17 = vadd.f32 %v49_v12, %v33_v11  ;;  %v66_v19 = vadd.f32 %v55_v16, %v39_v15  ;;  %v35_v20 = vld [vmem:[#allocation2 + $0x20] ss:$2 sm:$0xff]  ;;  %v51_v21 = vld [vmem:[#allocation2 + $0x21] ss:$2 sm:$0xff]  ;;  %v45_v22 = vld [vmem:[#allocation2 + $0x70] ss:$2 sm:$0xff] }
   0xc   :  { %405 = vmatmul.msk.f32.vlgmr.msra.gmra.mxu1 %vm72_vm0, %v65_v10  ;;  %v61_v23 = vld [vmem:[#allocation2 + $0x71] ss:$2 sm:$0xff]  ;;  %v64_v24 = vadd.f32 %v51_v21, %v35_v20  ;;  %v485_v30 = vmov 1983009808   ;;  %v486_v42 = vmov 1934713408  }
   0xd   :  { %v69_v25 = vadd.f32 %v61_v23, %v45_v22  ;;  %v145_v31 = vunpack.c.l.s4 %v485_v30  ;;  %v169_v43 = vunpack.c.l.s4 %v486_v42  ;;  %s487_s0 = smov 16   ;;  %s488_s2 = smov 32   ;;  %vm224_vm2 = vcmask 64512  }
   0xe   :  { %s489_s23 = smov 48   ;;  %s490_s24 = smov 56   ;;  %vm227_vm3 = vcmask 195584   ;;  %vm229_vm4 = vcmask 261120   ;;  %vm231_vm5 = vcmask 326656   ;;  %vm233_vm6 = vcmask 392192  }
   0xf   :  { %v146_v34 = vunpack.c.0.s8 %v145_v31  ;;  %v538_v51 = vunpack.c.0.s8 %v169_v43  ;;  %s491_s25 = smov 40   ;;  %s492_s26 = smov 24   ;;  %vm235_vm7 = vcmask 457728   ;;  %vm241_vm8 = vcmask 1043456  }
  0x10   :  { %vm237_vm9 = vcmask 31744   ;;  %vm265_vm10 = vcmask 523264   ;;  %s389_s5 = sshll.u32 %s608_s3, 4  ;;  %s390_s5 = int_to_ptr.hbm [resolvable:$true] %s389_s5 }
  0x12   :  { %403 = vmatmul.msk.f32.gmra.mxu0 %vm72_vm0, %v63_v17 }
  0x13   :  { %408 = vmatmul.msk.f32.gmra.mxu3 %vm72_vm0, %v68_v18 }
  0x14   :  { %406 = vmatmul.msk.f32.gmra.mxu1 %vm72_vm0, %v66_v19 }
  0x1a   :  { %404 = vmatmul.msk.f32.gmra.mxu0 %vm72_vm0, %v64_v24 }
  0x1b   :  { %409 = vmatmul.msk.f32.gmra.mxu3 %vm72_vm0, %v69_v25 }
  0x87   :  { %v114_v26 = vpop.f32.mrf.mxu0 }
  0x88   :  { %v142_v10 = vrot.slane %v114_v26, 4 }
  0x89   :  { %v123_v27 = vpop.f32.mrf.mxu1 }
  0x8a   :  { %v152_v32 = vrot.slane %v123_v27, 4 }
  0x8e   :  { %v129_v28 = vpop.f32.mrf.mxu3 }
  0x8f   :  { %v117_v29 = vpop.f32.mrf.mxu0  ;;  %v281_v48 = vrot.slane %v129_v28, 4 }
  0x90   :  { %v153_v35 = vsel %vm140_vm1, %v152_v32, %v117_v29  ;;  %v154_v1 = vrot.slane %v117_v29, 4 }
  0x91   :  { %v126_v33 = vpop.f32.mrf.mxu1  ;;  %v159_v38 = vperm.slane %v153_v35, %v146_v34 }
  0x92   :  { %v269_v36 = vrot.slane %v126_v33, 4  ;;  %v155_v11 = vsel %vm140_vm1, %v123_v27, %v154_v1 }
  0x93   :  { %v164_v46 = vrot.slane %v159_v38, 4  ;;  %v163_v16 = vperm.slane %v155_v11, %v146_v34 }
  0x95   :  { %v176_v21 = vrot.slane %v163_v16, 4 }
  0x96   :  { %v132_v37 = vpop.f32.mrf.mxu3 }
  0x97   :  { %v120_v39 = vpop.f32.mrf.mxu0  ;;  %v267_v40 = vrot.slane %v132_v37, 4  ;;  %v270_v44 = vsel %vm140_vm1, %v132_v37, %v269_v36 }
  0x98   :  { %v139_v41 = vrot.slane %v120_v39, 4  ;;  %v278_v50 = vperm.slane %v270_v44, %v146_v34  ;;  %v143_v14 = vsel %vm140_vm1, %v120_v39, %v142_v10 }
  0x99   :  { %v268_v49 = vsel %vm140_vm1, %v267_v40, %v126_v33  ;;  %v151_v19 = vperm.slane %v143_v14, %v146_v34 }
  0x9a   :  { %v141_v45 = vsel %vm140_vm1, %v139_v41, %v114_v26  ;;  %v274_v58 = vperm.slane %v268_v49, %v146_v34  ;;  %v305_v61 = vrot.slane %v278_v50, 4 }
  0x9b   :  { %v147_v47 = vperm.slane %v141_v45, %v146_v34  ;;  %v177_v25 = vsel %vm140_vm1, %v176_v21, %v151_v19  ;;  %v178_v32 = vrot.slane %v151_v19, 4 }
  0x9c   :  { %v293_v8 = vrot.slane %v274_v58, 4 }
  0x9d   :  { %v166_v53 = vrot.slane %v147_v47, 4  ;;  %v165_v54 = vsel %vm140_vm1, %v164_v46, %v147_v47  ;;  %v179_v36 = vsel %vm140_vm1, %v163_v16, %v178_v32 }
  0x9e   :  { %v135_v52 = vpop.f32.mrf.mxu3  ;;  %v543_v57 = vperm.slane %v165_v54, %v538_v51  ;;  %v187_v37 = vperm.slane %v179_v36, %v538_v51 }
  0x9f   :  { %v279_v55 = vrot.slane %v135_v52, 4  ;;  %v282_v56 = vsel %vm140_vm1, %v135_v52, %v281_v48  ;;  %v167_v60 = vsel %vm140_vm1, %v159_v38, %v166_v53 }
  0xa0   :  { %v290_v59 = vperm.slane %v282_v56, %v146_v34  ;;  %v175_v63 = vperm.slane %v167_v60, %v538_v51  ;;  %v188_v0 = vrot.slane %v543_v57, 4  ;;  %v194_v38 = vrot.slane %v187_v37, 4 }
  0xa1   :  { %v280_v62 = vsel %vm140_vm1, %v279_v55, %v129_v28  ;;  %v183_v28 = vperm.slane %v177_v25, %v538_v51  ;;  %v138_v55 = vld [vmem:[%s606_s1] sm:$0xff]  ;;  %s493_s1 = smov [#allocation5]  }
  0xa2   :  { %v286_v2 = vperm.slane %v280_v62, %v146_v34  ;;  %v303_v3 = vrot.slane %v290_v59, 4  ;;  %201 = vrot.lane.b32.xlu2 %v175_v63, %s487_s0  ;;  %v189_v4 = vsel %vm140_vm1, 0.0, %v188_v0  ;;  %v306_v5 = vsel %vm140_vm1, %v290_v59, %v305_v61  ;;  %s387_s29 = sshll.u32 %s493_s1, 4  ;;  %s388_s29 = int_to_ptr.vmem [resolvable:$true] %s387_s29 }
  0xa3   :  { %197 = vrot.lane.b32.xlu0 %v189_v4, %s484_s18  ;;  %v314_v12 = vperm.slane %v306_v5, %v538_v51  ;;  %v192_v31 = vrot.slane %v183_v28, 4  ;;  %v190_v33 = vrot.slane %v175_v63, 4  ;;  %v195_v39 = vsel %vm140_vm1, 0.0, %v194_v38 }
  0xa4   :  { %v291_v6 = vrot.slane %v286_v2, 4  ;;  %v304_v7 = vsel %vm140_vm1, %v303_v3, %v278_v50  ;;  %v294_v13 = vsel %vm140_vm1, %v286_v2, %v293_v8 }
  0xa5   :  { %v310_v9 = vperm.slane %v304_v7, %v538_v51  ;;  %v302_v17 = vperm.slane %v294_v13, %v538_v51  ;;  %v321_v18 = vrot.slane %v314_v12, 4  ;;  %v193_v34 = vsel %vm140_vm1, 0.0, %v192_v31 }
  0xa6   :  { %v292_v15 = vsel %vm140_vm1, %v291_v6, %v274_v58  ;;  %v191_v35 = vsel %vm140_vm1, 0.0, %v190_v33 }
  0xa7   :  { %336 = vrot.lane.b32.xlu1 %v310_v9, %s488_s2  ;;  %v298_v20 = vperm.slane %v292_v15, %v538_v51  ;;  %v319_v22 = vrot.slane %v310_v9, 4  ;;  %v322_v23 = vsel %vm140_vm1, 0.0, %v321_v18  ;;  %v317_v27 = vrot.slane %v302_v17, 4 }
  0xa9   :  { %v315_v24 = vrot.slane %v298_v20, 4  ;;  %v320_v26 = vsel %vm140_vm1, 0.0, %v319_v22  ;;  %v318_v30 = vsel %vm140_vm1, 0.0, %v317_v27 }
  0xaa   :  { %344 = vrot.lane.b32.xlu2 %v314_v12, %s489_s23 }
  0xab   :  { %328 = vrot.lane.b32.xlu0 %v302_v17, %s487_s0  ;;  %v316_v29 = vsel %vm140_vm1, 0.0, %v315_v24 }
  0xaf   :  { %348 = vrot.lane.b32.xlu1 %v322_v23, %s490_s24 }
  0xb2   :  { %340 = vrot.lane.b32.xlu2 %v320_v26, %s491_s25 }
  0xb3   :  { %324 = vrot.lane.b32.xlu0 %v316_v29, %s484_s18 }
  0xb7   :  { %332 = vrot.lane.b32.xlu1 %v318_v30, %s492_s26 }
  0xba   :  { %213 = vrot.lane.b32.xlu2 %v193_v34, %s491_s25 }
  0xbb   :  { %205 = vrot.lane.b32.xlu0 %v191_v35, %s492_s26 }
  0xbf   :  { %209 = vrot.lane.b32.xlu1 %v183_v28, %s488_s2 }
  0xc3   :  { %217 = vrot.lane.b32.xlu0 %v187_v37, %s489_s23 }
  0xc7   :  { %221 = vrot.lane.b32.xlu1 %v195_v39, %s490_s24 }
  0xfc   :  { %v202_v41 = vpop.permute.xlu2 %201 }
 0x104   :  { %v345_v44 = vpop.permute.xlu2 %344 }
 0x10c   :  { %v341_v51 = vpop.permute.xlu2 %340 }
 0x114   :  { %v214_v1 = vpop.permute.xlu2 %213 }
 0x115   :  { %v198_v40 = vpop.permute.xlu0 %197 }
 0x116   :  { %v225_v59 = vsel %vm224_vm2, %v543_v57, %v198_v40 }
 0x117   :  { %v226_v61 = vsel %vm72_vm0, %v225_v59, %v202_v41 }
 0x119   :  { %v337_v42 = vpop.permute.xlu1 %336 }
 0x11d   :  { %v329_v43 = vpop.permute.xlu0 %328 }
 0x121   :  { %v349_v45 = vpop.permute.xlu1 %348 }
 0x125   :  { %v325_v46 = vpop.permute.xlu0 %324 }
 0x126   :  { %v351_v47 = vsel %vm224_vm2, %v298_v20, %v325_v46 }
 0x127   :  { %v352_v48 = vsel %vm72_vm0, %v351_v47, %v329_v43 }
 0x129   :  { %v333_v49 = vpop.permute.xlu1 %332 }
 0x12a   :  { %v353_v50 = vsel %vm227_vm3, %v352_v48, %v333_v49 }
 0x12b   :  { %v354_v52 = vsel %vm229_vm4, %v353_v50, %v337_v42 }
 0x12c   :  { %v355_v53 = vsel %vm231_vm5, %v354_v52, %v341_v51 }
 0x12d   :  { %v356_v54 = vsel %vm233_vm6, %v355_v53, %v345_v44  ;;  %v206_v56 = vpop.permute.xlu0 %205 }
 0x12e   :  { %v357_v58 = vsel %vm235_vm7, %v356_v54, %v349_v45  ;;  %v228_v62 = vsel %vm227_vm3, %v226_v61, %v206_v56 }
 0x12f   :  { %412 = vmatpush.msk.msra.mxu2 %vm241_vm8, %v357_v58 }
 0x130   :  { %413 = vmatmul.msk.f32.vlgmr.msra.gmra.mxu2 %vm237_vm9, %v138_v55 }
 0x131   :  { %v210_v60 = vpop.permute.xlu1 %209 }
 0x132   :  { %v230_v63 = vsel %vm229_vm4, %v228_v62, %v210_v60 }
 0x133   :  { %v232_v2 = vsel %vm231_vm5, %v230_v63, %v214_v1 }
 0x135   :  { %v218_v0 = vpop.permute.xlu0 %217 }
 0x136   :  { %v234_v3 = vsel %vm233_vm6, %v232_v2, %v218_v0 }
 0x139   :  { %v222_v4 = vpop.permute.xlu1 %221 }
 0x13a   :  { %v236_v5 = vsel %vm235_vm7, %v234_v3, %v222_v4 }
 0x13b   :  { %410 = vmatpush.msk.msrb.mxu1 %vm241_vm8, %v236_v5 }
 0x13c   :  { %411 = vmatmul.msk.f32.vlgmr.msrb.gmra.mxu1 %vm237_vm9, %v138_v55 }
 0x1b3   :  { %v378_v57 = vpop.f32.mrf.mxu2 }
 0x1b4   :  { %382 = vst.msk [vmem:[#allocation5 + $0x8] sm:$0xff] %vm265_vm10, %v378_v57 }
 0x1b9   :  { %v262_v6 = vpop.f32.mrf.mxu1 }
 0x1ba   :  { %266 = vst.msk [vmem:[#allocation5] sm:$0xff] %vm265_vm10, %v262_v6 }
 0x1bb   :  { %395 = dma.vmem_to_hbm [thread:$0]  %s388_s29, 256, %s390_s5, [#allocation4], %s483_s17, %s483_s17, %s484_s18  }
 0x1bc   :  { %480 = dma.done.wait [#allocation4], 256  }
 0x1bd   :  { %481 = vsyncadd [#allocation4], 4294967040 }
 0x1be   :  { %400 = vsyncpa [#allocation3], 1 }
 0x1bf   :  { %401 = vsyncpa [#allocation4], 1 }

</bundles_post_ra>
